<compile_context>
chip_gen: v6e
topology: v6e:2x2x1
jax: 0.10.0
libtpu: 0.0.40
codegen_flags: <defaults>
</compile_context>

<pallas_src>
import functools

import jax
import jax.numpy as jnp
from jax.experimental import pallas as pl
from jax.experimental.pallas import tpu as pltpu


def _block_kernel(x_ref, w1_ref, w2_ref, b1_ref, b2_ref, o_ref, pad_ref, *,
                  H, WC):
    """One grid step: NB images -> conv/BN/SiLU -> conv/BN -> +x -> SiLU.

    x_ref  : (NB, H, WC)     lane-dense input tile (input dtype)
    w1_ref : (3, WC, WC)     conv1 banded weights * BN1 scale (bf16)
    w2_ref : (3, WC, WC)     conv2 banded weights * BN2 scale (bf16)
    b1_ref : (1, WC)         BN1 folded bias, tiled along W (f32)
    b2_ref : (1, WC)         BN2 folded bias, tiled along W (f32)
    o_ref  : (NB, H, WC)     lane-dense output tile
    pad_ref: (NB, H+2, WC)   VMEM scratch: H-padded conv input (bf16),
                             reused by both convolutions.
    """
    NB = x_ref.shape[0]
    cdt = pad_ref.dtype

    # Zero only the two halo rows (full 128-lane stores); the interior is
    # fully overwritten below.  Re-done every grid step so a scratch that
    # persists across steps / cores never leaks stale rows.
    zrow = jnp.zeros((NB, 1, WC), cdt)
    pad_ref[:, 0:1, :] = zrow
    pad_ref[:, H + 1:H + 2, :] = zrow

    x = x_ref[...]
    x_f32 = x.astype(jnp.float32)

    def banded_conv(w_ref, b_ref):
        # pad_ref rows dy..dy+H are the input shifted by dy-1 along H (with
        # zero padding); the banded weight applies the dx taps + W padding.
        acc = None
        for dy in range(3):
            tap = pad_ref[:, dy:dy + H, :].reshape(NB * H, WC)
            t = jnp.dot(tap, w_ref[dy], preferred_element_type=jnp.float32)
            acc = t if acc is None else acc + t
        return acc + b_ref[...]                    # (NB*H, WC) + (1, WC)

    # ---- conv1 (BN1 scale folded) + BN1 bias + SiLU, f32 elementwise ----
    pad_ref[:, 1:H + 1, :] = x.astype(cdt)
    y = banded_conv(w1_ref, b1_ref)
    y = y * jax.nn.sigmoid(y)

    # ---- conv2 (BN2 scale folded) + BN2 bias + residual + final SiLU ----
    pad_ref[:, 1:H + 1, :] = y.astype(cdt).reshape(NB, H, WC)
    z = banded_conv(w2_ref, b2_ref)
    z = z + x_f32.reshape(NB * H, WC)
    z = z * jax.nn.sigmoid(z)
    o_ref[...] = z.reshape(NB, H, WC).astype(o_ref.dtype)


def _banded_weights(w_hwio, bn_scale, W, compute_dtype):
    """Fold BN scale into the 3x3 HWIO weights and build, per kernel row dy,
    a (W*Cin, W*Cout) block-banded matrix that applies the three dx taps and
    the zero padding along W directly in the lane-dense (..., W*C) layout.

    out[h, w'] += x[h+dy-1, w] @ B_dy[w, :, w', :]  where
    B_dy[w, ci, w', co] = sum_dx w[dy, dx, ci, co] * [w' == w + 1 - dx]
    (missing bands at the edges implement the zero padding exactly).
    """
    _, _, Cin, Cout = w_hwio.shape
    w = w_hwio.astype(jnp.float32) * bn_scale.astype(jnp.float32)
    per_dy = []
    for dy in range(3):
        acc = jnp.zeros((W, Cin, W, Cout), jnp.float32)
        for dx in range(3):
            band = jnp.eye(W, k=1 - dx, dtype=jnp.float32)
            acc = acc + jnp.einsum("io,uv->uivo", w[dy, dx], band)
        per_dy.append(acc.reshape(W * Cin, W * Cout))
    return jnp.stack(per_dy, axis=0).astype(compute_dtype)  # (3, W*Cin, W*Cout)


@functools.partial(jax.jit, static_argnames=("compute_dtype", "batch_block"))
def block_with_swish(x_nhwc, w1, w2, bn1_scale, bn1_bias, bn2_scale, bn2_bias,
                     compute_dtype=jnp.bfloat16, batch_block=None):
    """Eval-mode BlockWithSwish (stride=1, downsample=None), NHWC.

    x_nhwc: (N, H, W, C). w1, w2: (3, 3, C, C) HWIO. bn*_scale / bn*_bias: (C,)
    folded from (gamma, beta, running_mean, running_var, eps).
    """
    N, H, W, Cin = x_nhwc.shape
    Cout = w1.shape[-1]
    assert Cin == Cout, "stride=1 / downsample=None requires Cin == Cout"
    assert H % 8 == 0, "H must be a multiple of 8 (sublane tile)"
    WC = W * Cout
    # Banded formulation materializes (W*C)^2 weights -> small-C regime only.
    # TODO(synk): for C >= 128 use per-tap K=C matmuls + H-tile grid axis.
    assert WC <= 2048, "banded-lane formulation is intended for small W*C"

    NB = N if batch_block is None else batch_block
    assert N % NB == 0

    # Fold BN scale into banded conv weights (f32 algebra, bf16 MXU operands);
    # biases pre-tiled to lane-dense (1, W*C) (512 B; avoids an in-kernel
    # sub-128-lane broadcast).
    w1b = _banded_weights(w1, bn1_scale, W, compute_dtype)
    w2b = _banded_weights(w2, bn2_scale, W, compute_dtype)
    b1t = jnp.tile(bn1_bias.astype(jnp.float32), W).reshape(1, WC)
    b2t = jnp.tile(bn2_bias.astype(jnp.float32), W).reshape(1, WC)

    # Lane-dense presentation (free reshape in XLA): last dim W*C (=128 here).
    x2d = x_nhwc.reshape(N, H, WC)

    kernel = functools.partial(_block_kernel, H=H, WC=WC)

    grid_spec = pltpu.PrefetchScalarGridSpec(
        num_scalar_prefetch=0,
        grid=(N // NB,),
        in_specs=[
            pl.BlockSpec((NB, H, WC), lambda n: (n, 0, 0)),
            # Grid-invariant operands.  grid == (1,) at the demo shape, so
            # there is no pipelining and hence no double-buffer waste; for
            # longer grids / larger C single-buffer these with
            # pipeline_mode=pl.Buffered(1).
            pl.BlockSpec((3, WC, WC), lambda n: (0, 0, 0)),
            pl.BlockSpec((3, WC, WC), lambda n: (0, 0, 0)),
            pl.BlockSpec((1, WC), lambda n: (0, 0)),
            pl.BlockSpec((1, WC), lambda n: (0, 0)),
        ],
        out_specs=pl.BlockSpec((NB, H, WC), lambda n: (n, 0, 0)),
        scratch_shapes=[pltpu.VMEM((NB, H + 2, WC), compute_dtype)],
    )

    out2d = pl.pallas_call(
        kernel,
        out_shape=jax.ShapeDtypeStruct((N, H, WC), x_nhwc.dtype),
        grid_spec=grid_spec,
        compiler_params=pltpu.CompilerParams(
            dimension_semantics=("parallel",)),
    )(x2d, w1b, w2b, b1t, b2t)

    return out2d.reshape(N, H, W, Cout)


def _reference(x, w1, w2, s1, b1, s2, b2, compute_dtype):
    """Pure-JAX eval-mode reference.  With compute_dtype=bf16 it mirrors the
    kernel numerics (BN scale folded into weights, bf16 MXU operands, f32
    accumulation); with f32 it is the exact eval-mode formula."""
    dn = jax.lax.conv_dimension_numbers(x.shape, w1.shape,
                                        ("NHWC", "HWIO", "NHWC"))
    w1f = (w1 * s1).astype(compute_dtype)
    w2f = (w2 * s2).astype(compute_dtype)
    y = jax.lax.conv_general_dilated(
        x.astype(compute_dtype), w1f, (1, 1), "SAME", dimension_numbers=dn,
        preferred_element_type=jnp.float32)
    y = y + b1
    y = jax.nn.silu(y)
    z = jax.lax.conv_general_dilated(
        y.astype(compute_dtype), w2f, (1, 1), "SAME", dimension_numbers=dn,
        preferred_element_type=jnp.float32)
    z = z + b2 + x
    return jax.nn.silu(z)


if __name__ == "__main__":
    key = jax.random.PRNGKey(0)
    kx, kw1, kw2, kg1, kb1, km1, kv1, kg2, kb2, km2, kv2 = jax.random.split(key, 11)

    # stride=1 / downsample=None requires in_channels == out_channels.  NHWC
    # here; the equivalent PyTorch NCHW input shape is [2, 8, 16, 16].
    N, H, W, C = 2, 16, 16, 8
    eps = 1e-5

    x = jax.random.normal(kx, (N, H, W, C), dtype=jnp.float32)
    w1 = jax.random.normal(kw1, (3, 3, C, C), dtype=jnp.float32) * 0.1
    w2 = jax.random.normal(kw2, (3, 3, C, C), dtype=jnp.float32) * 0.1

    # BatchNorm params + running stats, folded into (scale, bias) (eval mode).
    gamma1 = 1.0 + 0.1 * jax.random.normal(kg1, (C,), dtype=jnp.float32)
    beta1 = 0.1 * jax.random.normal(kb1, (C,), dtype=jnp.float32)
    mean1 = 0.1 * jax.random.normal(km1, (C,), dtype=jnp.float32)
    var1 = jnp.abs(jax.random.normal(kv1, (C,), dtype=jnp.float32)) + 0.5
    gamma2 = 1.0 + 0.1 * jax.random.normal(kg2, (C,), dtype=jnp.float32)
    beta2 = 0.1 * jax.random.normal(kb2, (C,), dtype=jnp.float32)
    mean2 = 0.1 * jax.random.normal(km2, (C,), dtype=jnp.float32)
    var2 = jnp.abs(jax.random.normal(kv2, (C,), dtype=jnp.float32)) + 0.5

    s1 = gamma1 / jnp.sqrt(var1 + eps)
    b1 = beta1 - mean1 * s1
    s2 = gamma2 / jnp.sqrt(var2 + eps)
    b2 = beta2 - mean2 * s2

    out = block_with_swish(x, w1, w2, s1, b1, s2, b2)
    out = jax.block_until_ready(out)
    assert out.shape == (N, H, W, C)

    # Tight check vs a reference with matching numerics (bf16 MXU operands,
    # f32 accumulation, BN scale folded into weights).
    ref_bf16 = _reference(x, w1, w2, s1, b1, s2, b2, jnp.bfloat16)
    err_matched = float(jnp.max(jnp.abs(out - ref_bf16)))
    assert err_matched < 2e-3, f"mismatch vs matched reference: {err_matched}"

    # Sanity check vs the exact f32 eval-mode formula (tolerance reflects the
    # bf16 MXU operand precision).
    ref_f32 = _reference(x, w1, w2, s1, b1, s2, b2, jnp.float32)
    err_f32 = float(jnp.max(jnp.abs(out - ref_f32)))
    assert err_f32 < 1e-1, f"mismatch vs f32 reference: {err_f32}"

    print("KERNEL_OK")
</pallas_src>

<mosaic_0001>
module attributes {stable_mosaic.version = 11 : i64} {
  func.func @_block_kernel(%arg0: i32, %arg1: memref<2x16x128xf32, #tpu.memory_space<vmem>>, %arg2: memref<3x128x128xbf16, #tpu.memory_space<vmem>>, %arg3: memref<3x128x128xbf16, #tpu.memory_space<vmem>>, %arg4: memref<1x128xf32, #tpu.memory_space<vmem>>, %arg5: memref<1x128xf32, #tpu.memory_space<vmem>>, %arg6: memref<2x16x128xf32, #tpu.memory_space<vmem>>, %arg7: memref<2x18x128xbf16, #tpu.memory_space<vmem>>) attributes {dimension_semantics = [#tpu.dimension_semantics<parallel>], iteration_bounds = array<i64: 1>, scalar_prefetch = 0 : i64, scratch_operands = 1 : i64, tpu.core_type = #tpu.core_type<tc>, window_params = [{transform_indices = @transform_0, window_bounds = array<i64: 2, 16, 128>}, {pipeline_mode = #tpu.pipeline_mode<synchronous>, transform_indices = @transform_1, window_bounds = array<i64: 3, 128, 128>}, {pipeline_mode = #tpu.pipeline_mode<synchronous>, transform_indices = @transform_2, window_bounds = array<i64: 3, 128, 128>}, {pipeline_mode = #tpu.pipeline_mode<synchronous>, transform_indices = @transform_3, window_bounds = array<i64: 1, 128>}, {pipeline_mode = #tpu.pipeline_mode<synchronous>, transform_indices = @transform_4, window_bounds = array<i64: 1, 128>}, {transform_indices = @transform_5, window_bounds = array<i64: 2, 16, 128>}]} {
    %cst = arith.constant 0.000000e+00 : bf16
    %0 = vector.broadcast %cst : bf16 to vector<2x1x128xbf16>
    %c0 = arith.constant 0 : index
    %c0_0 = arith.constant 0 : index
    %c0_1 = arith.constant 0 : index
    %1 = vector.load %arg7[%c0, %c0_0, %c0_1] : memref<2x18x128xbf16, #tpu.memory_space<vmem>>, vector<2x1x128xbf16>
    tpu.vector_store %arg7[%c0, %c0_0, %c0_1], %0 {strides = array<i32>} : memref<2x18x128xbf16, #tpu.memory_space<vmem>>, vector<2x1x128xbf16>,
    %c0_2 = arith.constant 0 : index
    %c17 = arith.constant 17 : index
    %c0_3 = arith.constant 0 : index
    %2 = vector.load %arg7[%c0_2, %c17, %c0_3] : memref<2x18x128xbf16, #tpu.memory_space<vmem>>, vector<2x1x128xbf16>
    tpu.vector_store %arg7[%c0_2, %c17, %c0_3], %0 {strides = array<i32>} : memref<2x18x128xbf16, #tpu.memory_space<vmem>>, vector<2x1x128xbf16>,
    %c0_4 = arith.constant 0 : index
    %c0_5 = arith.constant 0 : index
    %c0_6 = arith.constant 0 : index
    %3 = vector.load %arg1[%c0_4, %c0_5, %c0_6] : memref<2x16x128xf32, #tpu.memory_space<vmem>>, vector<2x16x128xf32>
    %4 = arith.truncf %3 : vector<2x16x128xf32> to vector<2x16x128xbf16>
    %c0_7 = arith.constant 0 : index
    %c1 = arith.constant 1 : index
    %c0_8 = arith.constant 0 : index
    %5 = vector.load %arg7[%c0_7, %c1, %c0_8] : memref<2x18x128xbf16, #tpu.memory_space<vmem>>, vector<2x16x128xbf16>
    tpu.vector_store %arg7[%c0_7, %c1, %c0_8], %4 {strides = array<i32>} : memref<2x18x128xbf16, #tpu.memory_space<vmem>>, vector<2x16x128xbf16>,
    %c0_9 = arith.constant 0 : index
    %c0_10 = arith.constant 0 : index
    %c0_11 = arith.constant 0 : index
    %6 = vector.load %arg7[%c0_9, %c0_10, %c0_11] : memref<2x18x128xbf16, #tpu.memory_space<vmem>>, vector<2x16x128xbf16>
    %7 = vector.shape_cast %6 : vector<2x16x128xbf16> to vector<32x128xbf16>
    %c0_12 = arith.constant 0 : index
    %c0_13 = arith.constant 0 : index
    %c0_14 = arith.constant 0 : index
    %8 = vector.load %arg2[%c0_12, %c0_13, %c0_14] : memref<3x128x128xbf16, #tpu.memory_space<vmem>>, vector<1x128x128xbf16>
    %9 = vector.shape_cast %8 : vector<1x128x128xbf16> to vector<128x128xbf16>
    %cst_15 = arith.constant dense<0.000000e+00> : vector<32x128xf32>
    %10 = tpu.matmul %7, %9, %cst_15 {dimension_numbers = #tpu.dot_dimension_numbers<[1], [0], [0], [1], [0, 0, 1, 1], [], []>} : vector<32x128xbf16>, vector<128x128xbf16>, vector<32x128xf32> -> vector<32x128xf32>
    %c0_16 = arith.constant 0 : index
    %c1_17 = arith.constant 1 : index
    %c0_18 = arith.constant 0 : index
    %11 = vector.load %arg7[%c0_16, %c1_17, %c0_18] : memref<2x18x128xbf16, #tpu.memory_space<vmem>>, vector<2x16x128xbf16>
    %12 = vector.shape_cast %11 : vector<2x16x128xbf16> to vector<32x128xbf16>
    %c1_19 = arith.constant 1 : index
    %c0_20 = arith.constant 0 : index
    %c0_21 = arith.constant 0 : index
    %13 = vector.load %arg2[%c1_19, %c0_20, %c0_21] : memref<3x128x128xbf16, #tpu.memory_space<vmem>>, vector<1x128x128xbf16>
    %14 = vector.shape_cast %13 : vector<1x128x128xbf16> to vector<128x128xbf16>
    %cst_22 = arith.constant dense<0.000000e+00> : vector<32x128xf32>
    %15 = tpu.matmul %12, %14, %cst_22 {dimension_numbers = #tpu.dot_dimension_numbers<[1], [0], [0], [1], [0, 0, 1, 1], [], []>} : vector<32x128xbf16>, vector<128x128xbf16>, vector<32x128xf32> -> vector<32x128xf32>
    %16 = arith.addf %10, %15 : vector<32x128xf32>
    %c0_23 = arith.constant 0 : index
    %c2 = arith.constant 2 : index
    %c0_24 = arith.constant 0 : index
    %17 = vector.load %arg7[%c0_23, %c2, %c0_24] : memref<2x18x128xbf16, #tpu.memory_space<vmem>>, vector<2x16x128xbf16>
    %18 = vector.shape_cast %17 : vector<2x16x128xbf16> to vector<32x128xbf16>
    %c2_25 = arith.constant 2 : index
    %c0_26 = arith.constant 0 : index
    %c0_27 = arith.constant 0 : index
    %19 = vector.load %arg2[%c2_25, %c0_26, %c0_27] : memref<3x128x128xbf16, #tpu.memory_space<vmem>>, vector<1x128x128xbf16>
    %20 = vector.shape_cast %19 : vector<1x128x128xbf16> to vector<128x128xbf16>
    %cst_28 = arith.constant dense<0.000000e+00> : vector<32x128xf32>
    %21 = tpu.matmul %18, %20, %cst_28 {dimension_numbers = #tpu.dot_dimension_numbers<[1], [0], [0], [1], [0, 0, 1, 1], [], []>} : vector<32x128xbf16>, vector<128x128xbf16>, vector<32x128xf32> -> vector<32x128xf32>
    %22 = arith.addf %16, %21 : vector<32x128xf32>
    %c0_29 = arith.constant 0 : index
    %c0_30 = arith.constant 0 : index
    %23 = vector.load %arg4[%c0_29, %c0_30] : memref<1x128xf32, #tpu.memory_space<vmem>>, vector<1x128xf32>
    %24 = vector.broadcast %23 : vector<1x128xf32> to vector<32x128xf32>
    %25 = arith.addf %22, %24 : vector<32x128xf32>
    %26 = arith.negf %25 : vector<32x128xf32>
    %27 = math.exp %26 : vector<32x128xf32>
    %cst_31 = arith.constant 1.000000e+00 : f32
    %28 = vector.broadcast %cst_31 : f32 to vector<32x128xf32>
    %29 = arith.addf %28, %27 : vector<32x128xf32>
    %30 = arith.divf %28, %29 : vector<32x128xf32>
    %31 = arith.mulf %25, %30 : vector<32x128xf32>
    %32 = arith.truncf %31 : vector<32x128xf32> to vector<32x128xbf16>
    %33 = vector.shape_cast %32 : vector<32x128xbf16> to vector<2x16x128xbf16>
    %c0_32 = arith.constant 0 : index
    %c1_33 = arith.constant 1 : index
    %c0_34 = arith.constant 0 : index
    %34 = vector.load %arg7[%c0_32, %c1_33, %c0_34] : memref<2x18x128xbf16, #tpu.memory_space<vmem>>, vector<2x16x128xbf16>
    tpu.vector_store %arg7[%c0_32, %c1_33, %c0_34], %33 {strides = array<i32>} : memref<2x18x128xbf16, #tpu.memory_space<vmem>>, vector<2x16x128xbf16>,
    %c0_35 = arith.constant 0 : index
    %c0_36 = arith.constant 0 : index
    %c0_37 = arith.constant 0 : index
    %35 = vector.load %arg7[%c0_35, %c0_36, %c0_37] : memref<2x18x128xbf16, #tpu.memory_space<vmem>>, vector<2x16x128xbf16>
    %36 = vector.shape_cast %35 : vector<2x16x128xbf16> to vector<32x128xbf16>
    %c0_38 = arith.constant 0 : index
    %c0_39 = arith.constant 0 : index
    %c0_40 = arith.constant 0 : index
    %37 = vector.load %arg3[%c0_38, %c0_39, %c0_40] : memref<3x128x128xbf16, #tpu.memory_space<vmem>>, vector<1x128x128xbf16>
    %38 = vector.shape_cast %37 : vector<1x128x128xbf16> to vector<128x128xbf16>
    %cst_41 = arith.constant dense<0.000000e+00> : vector<32x128xf32>
    %39 = tpu.matmul %36, %38, %cst_41 {dimension_numbers = #tpu.dot_dimension_numbers<[1], [0], [0], [1], [0, 0, 1, 1], [], []>} : vector<32x128xbf16>, vector<128x128xbf16>, vector<32x128xf32> -> vector<32x128xf32>
    %c0_42 = arith.constant 0 : index
    %c1_43 = arith.constant 1 : index
    %c0_44 = arith.constant 0 : index
    %40 = vector.load %arg7[%c0_42, %c1_43, %c0_44] : memref<2x18x128xbf16, #tpu.memory_space<vmem>>, vector<2x16x128xbf16>
    %41 = vector.shape_cast %40 : vector<2x16x128xbf16> to vector<32x128xbf16>
    %c1_45 = arith.constant 1 : index
    %c0_46 = arith.constant 0 : index
    %c0_47 = arith.constant 0 : index
    %42 = vector.load %arg3[%c1_45, %c0_46, %c0_47] : memref<3x128x128xbf16, #tpu.memory_space<vmem>>, vector<1x128x128xbf16>
    %43 = vector.shape_cast %42 : vector<1x128x128xbf16> to vector<128x128xbf16>
    %cst_48 = arith.constant dense<0.000000e+00> : vector<32x128xf32>
    %44 = tpu.matmul %41, %43, %cst_48 {dimension_numbers = #tpu.dot_dimension_numbers<[1], [0], [0], [1], [0, 0, 1, 1], [], []>} : vector<32x128xbf16>, vector<128x128xbf16>, vector<32x128xf32> -> vector<32x128xf32>
    %45 = arith.addf %39, %44 : vector<32x128xf32>
    %c0_49 = arith.constant 0 : index
    %c2_50 = arith.constant 2 : index
    %c0_51 = arith.constant 0 : index
    %46 = vector.load %arg7[%c0_49, %c2_50, %c0_51] : memref<2x18x128xbf16, #tpu.memory_space<vmem>>, vector<2x16x128xbf16>
    %47 = vector.shape_cast %46 : vector<2x16x128xbf16> to vector<32x128xbf16>
    %c2_52 = arith.constant 2 : index
    %c0_53 = arith.constant 0 : index
    %c0_54 = arith.constant 0 : index
    %48 = vector.load %arg3[%c2_52, %c0_53, %c0_54] : memref<3x128x128xbf16, #tpu.memory_space<vmem>>, vector<1x128x128xbf16>
    %49 = vector.shape_cast %48 : vector<1x128x128xbf16> to vector<128x128xbf16>
    %cst_55 = arith.constant dense<0.000000e+00> : vector<32x128xf32>
    %50 = tpu.matmul %47, %49, %cst_55 {dimension_numbers = #tpu.dot_dimension_numbers<[1], [0], [0], [1], [0, 0, 1, 1], [], []>} : vector<32x128xbf16>, vector<128x128xbf16>, vector<32x128xf32> -> vector<32x128xf32>
    %51 = arith.addf %45, %50 : vector<32x128xf32>
    %c0_56 = arith.constant 0 : index
    %c0_57 = arith.constant 0 : index
    %52 = vector.load %arg5[%c0_56, %c0_57] : memref<1x128xf32, #tpu.memory_space<vmem>>, vector<1x128xf32>
    %53 = vector.broadcast %52 : vector<1x128xf32> to vector<32x128xf32>
    %54 = arith.addf %51, %53 : vector<32x128xf32>
    %55 = vector.shape_cast %3 : vector<2x16x128xf32> to vector<32x128xf32>
    %56 = arith.addf %54, %55 : vector<32x128xf32>
    %57 = arith.negf %56 : vector<32x128xf32>
    %58 = math.exp %57 : vector<32x128xf32>
    %cst_58 = arith.constant 1.000000e+00 : f32
    %59 = vector.broadcast %cst_58 : f32 to vector<32x128xf32>
    %60 = arith.addf %59, %58 : vector<32x128xf32>
    %61 = arith.divf %59, %60 : vector<32x128xf32>
    %62 = arith.mulf %56, %61 : vector<32x128xf32>
    %63 = vector.shape_cast %62 : vector<32x128xf32> to vector<2x16x128xf32>
    %c0_59 = arith.constant 0 : index
    %c0_60 = arith.constant 0 : index
    %c0_61 = arith.constant 0 : index
    %64 = vector.load %arg6[%c0_59, %c0_60, %c0_61] : memref<2x16x128xf32, #tpu.memory_space<vmem>>, vector<2x16x128xf32>
    tpu.vector_store %arg6[%c0_59, %c0_60, %c0_61], %63 {strides = array<i32>} : memref<2x16x128xf32, #tpu.memory_space<vmem>>, vector<2x16x128xf32>,
    return
  }
  func.func @transform_0(%arg0: i32) -> (i32, i32, i32) {
    %c0_i32 = arith.constant 0 : i32
    %c0_i32_0 = arith.constant 0 : i32
    %c0_i32_1 = arith.constant 0 : i32
    return %arg0, %c0_i32, %c0_i32_0 : i32, i32, i32
  }
  func.func @transform_1(%arg0: i32) -> (i32, i32, i32) {
    %c0_i32 = arith.constant 0 : i32
    %c0_i32_0 = arith.constant 0 : i32
    %c0_i32_1 = arith.constant 0 : i32
    %c0_i32_2 = arith.constant 0 : i32
    return %c0_i32, %c0_i32_0, %c0_i32_1 : i32, i32, i32
  }
  func.func @transform_2(%arg0: i32) -> (i32, i32, i32) {
    %c0_i32 = arith.constant 0 : i32
    %c0_i32_0 = arith.constant 0 : i32
    %c0_i32_1 = arith.constant 0 : i32
    %c0_i32_2 = arith.constant 0 : i32
    return %c0_i32, %c0_i32_0, %c0_i32_1 : i32, i32, i32
  }
  func.func @transform_3(%arg0: i32) -> (i32, i32) {
    %c0_i32 = arith.constant 0 : i32
    %c0_i32_0 = arith.constant 0 : i32
    %c0_i32_1 = arith.constant 0 : i32
    return %c0_i32, %c0_i32_0 : i32, i32
  }
  func.func @transform_4(%arg0: i32) -> (i32, i32) {
    %c0_i32 = arith.constant 0 : i32
    %c0_i32_0 = arith.constant 0 : i32
    %c0_i32_1 = arith.constant 0 : i32
    return %c0_i32, %c0_i32_0 : i32, i32
  }
  func.func @transform_5(%arg0: i32) -> (i32, i32, i32) {
    %c0_i32 = arith.constant 0 : i32
    %c0_i32_0 = arith.constant 0 : i32
    %c0_i32_1 = arith.constant 0 : i32
    return %arg0, %c0_i32, %c0_i32_0 : i32, i32, i32
  }
}

</mosaic_0001>

<bundles_post_ra>
// kernel: tile.13
= control target key start
LH: loop header
LB: loop body
LE: loop exit
PB: predicated region body
PF: predicated region fallthrough
CT: control target
= control target key end

     0   :  { %s28_s0 = inlined_call_operand.vmem [shape: f32[8], index: 0, kind: input, shape index: {}]   ;;  %s29_s1 = inlined_call_operand.vmem [shape: f32[16,8], index: 1, kind: output, shape index: {}]  }
   0x1   :  { %v4_v0 = vld [vmem:[%s28_s0] ss:$0 sm:$0xff] }
   0x2   :  { %5 = vst [vmem:[%s29_s1] sm:$0xff] %v4_v0  ;;  %8 = vst [vmem:[%s29_s1 + $0x8] sm:$0xff] %v4_v0 }

// kernel: tile.14
= control target key start
LH: loop header
LB: loop body
LE: loop exit
PB: predicated region body
PF: predicated region fallthrough
CT: control target
= control target key end

     0   :  { %s133_s10 = smov 120   ;;  %s134_s11 = smov 104   ;;  %vm3_vm0 = vcmask 64512   ;;  %vm9_vm1 = vcmask 1048512   ;;  %vm15_vm2 = vcmask 982912   ;;  %vm21_vm3 = vcmask 917312   ;;  %s209_s0 = inlined_call_operand.vmem [shape: f32[16,8], index: 0, kind: input, shape index: {}]   ;;  %s210_s1 = inlined_call_operand.vmem [shape: f32[1,128], index: 1, kind: output, shape index: {}]  }
   0x1   :  { %v103_v0 = vld [vmem:[%s209_s0 + $0xf] sm:$0x1]   ;;  %v105_v1 = vld [vmem:[%s209_s0 + $0xd] sm:$0x1]   ;;  %v104_v2 = vld [vmem:[%s209_s0 + $0xe] sm:$0x1]  }
   0x2   :  { %7 = vrot.lane.b32.xlu0 %v103_v0, %s133_s10  ;;  %19 = vrot.lane.b32.xlu1 %v105_v1, %s134_s11  ;;  %v106_v3 = vld [vmem:[%s209_s0 + $0xc] sm:$0x1]   ;;  %s135_s16 = smov 112   ;;  %s136_s17 = smov 96   ;;  %v107_v4 = vld [vmem:[%s209_s0 + $0xb] sm:$0x1]  }
   0x3   :  { %v108_v5 = vld [vmem:[%s209_s0 + $0xa] sm:$0x1]   ;;  %v2_v6 = vld [vmem:[%s209_s0] sm:$0x1]   ;;  %s137_s24 = smov 88   ;;  %s138_s25 = smov 80  }
   0x4   :  { %4 = vst.msk [vmem:[#allocation0] sm:$0x1] %vm3_vm0, %v2_v6   ;;  %v109_v7 = vld [vmem:[%s209_s0 + $0x9] sm:$0x1]   ;;  %v110_v8 = vld [vmem:[%s209_s0 + $0x8] sm:$0x1]  }
   0x5   :  { %s139_s30 = smov 72   ;;  %s140_s2 = smov 64   ;;  %v111_v9 = vld [vmem:[%s209_s0 + $0x7] sm:$0x1]   ;;  %v112_v10 = vld [vmem:[%s209_s0 + $0x6] sm:$0x1]  }
   0x6   :  { %13 = vrot.lane.b32.xlu0 %v104_v2, %s135_s16  ;;  %25 = vrot.lane.b32.xlu1 %v106_v3, %s136_s17  ;;  %s141_s7 = smov 56   ;;  %s142_s8 = smov 48   ;;  %v113_v11 = vld [vmem:[%s209_s0 + $0x5] sm:$0x1]   ;;  %v114_v12 = vld [vmem:[%s209_s0 + $0x4] sm:$0x1]  }
   0x7   :  { %s143_s13 = smov 40   ;;  %s144_s14 = smov 32   ;;  %v115_v13 = vld [vmem:[%s209_s0 + $0x3] sm:$0x1]   ;;  %v116_v14 = vld [vmem:[%s209_s0 + $0x2] sm:$0x1]  }
   0x8   :  { %s145_s19 = smov 24   ;;  %s146_s20 = smov 16   ;;  %v117_v15 = vld [vmem:[%s209_s0 + $0x1] sm:$0x1]   ;;  %vm27_vm4 = vcmask 851712   ;;  %vm33_vm5 = vcmask 786112  }
   0x9   :  { %s147_s0 = smov 8   ;;  %vm39_vm6 = vcmask 720512   ;;  %vm45_vm7 = vcmask 654912   ;;  %vm51_vm8 = vcmask 589312   ;;  %vm57_vm9 = vcmask 523712  }
   0xa   :  { %31 = vrot.lane.b32.xlu0 %v107_v4, %s137_s24  ;;  %37 = vrot.lane.b32.xlu1 %v108_v5, %s138_s25  ;;  %vm63_vm10 = vcmask 458112   ;;  %vm69_vm11 = vcmask 392512   ;;  %vm75_vm12 = vcmask 326912   ;;  %vm81_vm13 = vcmask 261312  }
   0xb   :  { %vm87_vm14 = vcmask 195712   ;;  %vm93_vm15 = vcmask 130112  }
   0xe   :  { %43 = vrot.lane.b32.xlu0 %v109_v7, %s139_s30  ;;  %49 = vrot.lane.b32.xlu1 %v110_v8, %s140_s2 }
  0x12   :  { %55 = vrot.lane.b32.xlu0 %v111_v9, %s141_s7  ;;  %61 = vrot.lane.b32.xlu1 %v112_v10, %s142_s8 }
  0x16   :  { %67 = vrot.lane.b32.xlu0 %v113_v11, %s143_s13  ;;  %73 = vrot.lane.b32.xlu1 %v114_v12, %s144_s14 }
  0x1a   :  { %79 = vrot.lane.b32.xlu0 %v115_v13, %s145_s19  ;;  %85 = vrot.lane.b32.xlu1 %v116_v14, %s146_s20 }
  0x1e   :  { %91 = vrot.lane.b32.xlu0 %v117_v15, %s147_s0 }
  0x74   :  { %v8_v16 = vpop.permute.xlu0 %7   ;;  %v20_v17 = vpop.permute.xlu1 %19  }
  0x75   :  { %10 = vst.msk [vmem:[#allocation0] sm:$0x1] %vm9_vm1, %v8_v16  }
  0x78   :  { %v14_v18 = vpop.permute.xlu0 %13   ;;  %v26_v19 = vpop.permute.xlu1 %25  }
  0x79   :  { %16 = vst.msk [vmem:[#allocation0] sm:$0x1] %vm15_vm2, %v14_v18  }
  0x7a   :  { %22 = vst.msk [vmem:[#allocation0] sm:$0x1] %vm21_vm3, %v20_v17  }
  0x7b   :  { %28 = vst.msk [vmem:[#allocation0] sm:$0x1] %vm27_vm4, %v26_v19  }
  0x7c   :  { %v32_v20 = vpop.permute.xlu0 %31   ;;  %v38_v21 = vpop.permute.xlu1 %37  }
  0x7d   :  { %34 = vst.msk [vmem:[#allocation0] sm:$0x1] %vm33_vm5, %v32_v20  }
  0x7e   :  { %40 = vst.msk [vmem:[#allocation0] sm:$0x1] %vm39_vm6, %v38_v21  }
  0x80   :  { %v44_v22 = vpop.permute.xlu0 %43   ;;  %v50_v23 = vpop.permute.xlu1 %49  }
  0x81   :  { %46 = vst.msk [vmem:[#allocation0] sm:$0x1] %vm45_vm7, %v44_v22  }
  0x82   :  { %52 = vst.msk [vmem:[#allocation0] sm:$0x1] %vm51_vm8, %v50_v23  }
  0x84   :  { %v56_v24 = vpop.permute.xlu0 %55   ;;  %v62_v25 = vpop.permute.xlu1 %61  }
  0x85   :  { %58 = vst.msk [vmem:[#allocation0] sm:$0x1] %vm57_vm9, %v56_v24  }
  0x86   :  { %64 = vst.msk [vmem:[#allocation0] sm:$0x1] %vm63_vm10, %v62_v25  }
  0x88   :  { %v68_v26 = vpop.permute.xlu0 %67   ;;  %v74_v27 = vpop.permute.xlu1 %73  }
  0x89   :  { %70 = vst.msk [vmem:[#allocation0] sm:$0x1] %vm69_vm11, %v68_v26  }
  0x8a   :  { %76 = vst.msk [vmem:[#allocation0] sm:$0x1] %vm75_vm12, %v74_v27  }
  0x8c   :  { %v80_v28 = vpop.permute.xlu0 %79   ;;  %v86_v29 = vpop.permute.xlu1 %85  }
  0x8d   :  { %82 = vst.msk [vmem:[#allocation0] sm:$0x1] %vm81_vm13, %v80_v28  }
  0x8e   :  { %88 = vst.msk [vmem:[#allocation0] sm:$0x1] %vm87_vm14, %v86_v29  }
  0x90   :  { %v92_v30 = vpop.permute.xlu0 %91  }
  0x91   :  { %94 = vst.msk [vmem:[#allocation0] sm:$0x1] %vm93_vm15, %v92_v30  }
  0x98   :  { %v99_v31 = vld [vmem:[#allocation0] sm:$0x1] }
  0x99   :  { %102 = vst [vmem:[%s210_s1] sm:$0x1] %v99_v31 }

// kernel: block_with_swish.1
= control target key start
LH: loop header
LB: loop body
LE: loop exit
PB: predicated region body
PF: predicated region fallthrough
CT: control target
= control target key end

     0   :  { %vm22_vm0 = vsmask.f32 256  ;;  %v24_v9 = vld [vmem:[#allocation2] sm:$0x1]  ;;  %vm21_vm1 = vcmask 1040384   ;;  %vm96_vm6 = vcmask 1043456   ;;  %s1941_s1 = inlined_call_operand.vmem [shape: bf16[3,128,128], index: 1, kind: input, shape index: {}]   ;;  %s1942_s0 = inlined_call_operand.vmem [shape: f32[2,16,128], index: 0, kind: input, shape index: {}]   ;;  %s1943_s2 = inlined_call_operand.vmem [shape: bf16[3,128,128], index: 2, kind: input, shape index: {}]   ;;  %s1944_s3 = inlined_call_operand.vmem [shape: f32[1,128], index: 3, kind: input, shape index: {}]   ;;  %s1945_s4 = inlined_call_operand.vmem [shape: f32[1,128], index: 4, kind: input, shape index: {}]   ;;  %s1946_s5 = inlined_call_operand.vmem [shape: f32[2,16,128], index: 5, kind: output, shape index: {}]  }
   0x1   :  { %v1501_v0 = vld [vmem:[%s1941_s1 + $0x78] sm:$0xff]   ;;  %v1503_v2 = vld [vmem:[%s1941_s1 + $0x70] sm:$0xff]   ;;  %v1505_v4 = vld [vmem:[%s1941_s1 + $0x68] sm:$0xff]   ;;  %vm30_vm3 = vsmask.f32 7938  ;;  %vm422_vm9 = vcmask 1042432  }
   0x2   :  { %v1502_v1 = vld [vmem:[%s1941_s1 + $0x38] sm:$0xff]   ;;  %1381 = vmatprep.subr.bf16.mxu0 %v1501_v0  ;;  %v1504_v3 = vld [vmem:[%s1941_s1 + $0x30] sm:$0xff]   ;;  %v1506_v5 = vld [vmem:[%s1941_s1 + $0x28] sm:$0xff]   ;;  %vm54_vm5 = vsmask.f32 4368  ;;  %vm423_vm10 = vcmask 1046532  }
   0x3   :  { %1401 = vmatprep.subr.bf16.mxu1 %v1502_v1  ;;  %1382 = vmatpush3.bf16.msra.mxu0 %v1501_v0  ;;  %v1507_v6 = vld [vmem:[%s1941_s1 + $0x60] sm:$0xff]   ;;  %v1509_v8 = vld [vmem:[%s1941_s1 + $0x58] sm:$0xff]   ;;  %v1511_v11 = vld [vmem:[%s1941_s1 + $0x50] sm:$0xff]   ;;  %vm134_vm11 = vsmask.f32 3328 }
   0x4   :  { %1402 = vmatpush3.bf16.msra.mxu1 %v1502_v1  ;;  %1383 = vmatprep.subr.bf16.mxu0 %v1503_v2  ;;  %v1508_v7 = vld [vmem:[%s1941_s1 + $0x20] sm:$0xff]   ;;  %v1510_v10 = vld [vmem:[%s1941_s1 + $0x18] sm:$0xff]   ;;  %v1512_v12 = vld [vmem:[%s1941_s1 + $0x10] sm:$0xff]   ;;  %vm135_vm12 = vsmask.f32 7440 }
   0x5   :  { %1403 = vmatprep.subr.bf16.mxu1 %v1504_v3  ;;  %vm1652_vm2 = vmand %vm21_vm1, %vm22_vm0  ;;  %v27_v14 = vld [vmem:[#allocation2 + $0xc] sm:$0x1]  ;;  %v32_v15 = vld [vmem:[#allocation2 + $0x8] sm:$0x1] }
   0x6   :  { %v25_v16 = vsel %vm1652_vm2, 0, %v24_v9  ;;  %v28_v17 = vsel %vm1652_vm2, 0, %v27_v14  ;;  %vm1661_vm4 = vmand %vm21_vm1, %vm30_vm3  ;;  %v35_v19 = vld [vmem:[#allocation2 + $0x14] sm:$0x1]  ;;  %v1668_v20 = vld [vmem:[%s1942_s0] sm:$0xff] }
   0x7   :  { %1384 = vmatpush3.bf16.msra.mxu0 %v1503_v2  ;;  %26 = vst [vmem:[#allocation2] sm:$0x1] %v25_v16  ;;  %29 = vst [vmem:[#allocation2 + $0xc] sm:$0x1] %v28_v17  ;;  %v33_v21 = vsel %vm1661_vm4, 0, %v32_v15  ;;  %v36_v22 = vsel %vm1661_vm4, 0, %v35_v19  ;;  %v1313_v25 = vpack.c.bf16 %v1668_v20, %v1668_v20 }
   0x8   :  { %1404 = vmatpush3.bf16.msra.mxu1 %v1504_v3  ;;  %1385 = vmatprep.subr.bf16.mxu0 %v1505_v4  ;;  %v1677_v23 = vld [vmem:[%s1942_s0 + $0x8] sm:$0xff]  ;;  %v1682_v24 = vld [vmem:[%s1942_s0 + $0x10] sm:$0xff]  ;;  %34 = vst [vmem:[#allocation2 + $0x8] sm:$0x1] %v33_v21  ;;  %37 = vst [vmem:[#allocation2 + $0x14] sm:$0x1] %v36_v22 }
   0x9   :  { %1405 = vmatprep.subr.bf16.mxu1 %v1506_v5  ;;  %v1513_v26 = vld [vmem:[%s1941_s1 + $0x48] sm:$0xff]   ;;  %v1314_v28 = vpack.c.bf16 %v1677_v23, %v1677_v23  ;;  %v1315_v29 = vpack.c.bf16 %v1682_v24, %v1682_v24  ;;  %v1699_v30 = vld [vmem:[%s1942_s0 + $0x18] sm:$0xff]  ;;  %v57_v31 = vshrl.u32 %v1313_v25, 16  ;;  %v60_v32 = vshll.u32 %v1313_v25, 16  ;;  %v1515_v38 = vld [vmem:[%s1941_s1 + $0x40] sm:$0xff]  }
   0xa   :  { %v1514_v27 = vld [vmem:[%s1941_s1 + $0x8] sm:$0xff]   ;;  %v1316_v33 = vpack.c.bf16 %v1699_v30, %v1699_v30  ;;  %vm1708_vm7 = vmand %vm96_vm6, %vm30_vm3  ;;  %v1516_v45 = vld [vmem:[%s1941_s1] sm:$0xff]  }
   0xb   :  { %1386 = vmatpush3.bf16.msra.mxu0 %v1505_v4  ;;  %v65_v34 = vshrl.u32 %v1314_v28, 16  ;;  %v68_v35 = vshll.u32 %v1314_v28, 16  ;;  %v74_v36 = vshrl.u32 %v1315_v29, 16  ;;  %v77_v37 = vshll.u32 %v1315_v29, 16  ;;  %vm1717_vm8 = vmor %vm22_vm0, %vm54_vm5  ;;  %v1736_v2 = vld [vmem:[%s1941_s1 + $0xb8] sm:$0xff]  }
   0xc   :  { %1406 = vmatpush3.bf16.msra.mxu1 %v1506_v5  ;;  %1387 = vmatprep.subr.bf16.mxu0 %v1507_v6  ;;  %v59_v39 = vrot.slane %v57_v31, 7  ;;  %v82_v40 = vshrl.u32 %v1316_v33, 16  ;;  %v85_v41 = vshll.u32 %v1316_v33, 16  ;;  %vm1752_vm13 = vmor %vm134_vm11, %vm135_vm12  ;;  %v1547_v31 = vld [vmem:[%s1943_s2 + $0xa8] sm:$0xff]  }
   0xd   :  { %1407 = vmatprep.subr.bf16.mxu1 %v1508_v7  ;;  %v67_v42 = vrot.slane %v65_v34, 7  ;;  %v76_v43 = vrot.slane %v74_v36, 7  ;;  %vm1760_vm14 = vmor %vm422_vm9, %vm423_vm10 }
   0xe   :  { %v62_v47 = vor.u32 %v60_v32, %v59_v39  ;;  %v63_v48 = vrot.slane %v59_v39, 4  ;;  %v84_v49 = vrot.slane %v82_v40, 7  ;;  %v98_v53 = vld [vmem:[#allocation2] sm:$0xf]  ;;  %v105_v54 = vld [vmem:[#allocation2 + $0xc] sm:$0xf] }
   0xf   :  { %1388 = vmatpush3.bf16.msra.mxu0 %v1507_v6  ;;  %v70_v50 = vor.u32 %v68_v35, %v67_v42  ;;  %v72_v51 = vrot.slane %v67_v42, 4  ;;  %v79_v52 = vor.u32 %v77_v37, %v76_v43  ;;  %v80_v55 = vrot.slane %v76_v43, 4  ;;  %v102_v57 = vld [vmem:[#allocation2 + $0x8] sm:$0x1]  ;;  %v109_v60 = vld [vmem:[#allocation2 + $0x14] sm:$0x1] }
  0x10   :  { %1408 = vmatpush3.bf16.msra.mxu1 %v1508_v7  ;;  %1389 = vmatprep.subr.bf16.mxu0 %v1509_v8  ;;  %v99_v56 = vsel %vm1708_vm7, %v62_v47, %v98_v53  ;;  %v87_v58 = vor.u32 %v85_v41, %v84_v49  ;;  %v89_v59 = vrot.slane %v84_v49, 4 }
  0x11   :  { %1409 = vmatprep.subr.bf16.mxu1 %v1510_v10  ;;  %v71_v61 = vsel %vm1717_vm8, %v63_v48, %v70_v50  ;;  %100 = vst [vmem:[#allocation2] sm:$0xf] %v99_v56  ;;  %v103_v62 = vsel %vm1652_vm2, %v72_v51, %v102_v57  ;;  %v106_v63 = vsel %vm1708_vm7, %v79_v52, %v105_v54 }
  0x12   :  { %101 = vst [vmem:[#allocation2 + $0x4] sm:$0xf] %v71_v61  ;;  %104 = vst [vmem:[#allocation2 + $0x8] sm:$0x1] %v103_v62  ;;  %v88_v0 = vsel %vm1717_vm8, %v80_v55, %v87_v58  ;;  %v110_v1 = vsel %vm1652_vm2, %v89_v59, %v109_v60  ;;  %v1520_v62 = vld [vmem:[%s1941_s1 + $0xb0] sm:$0xff]  }
  0x13   :  { %1390 = vmatpush3.bf16.msra.mxu0 %v1509_v8  ;;  %107 = vst [vmem:[#allocation2 + $0xc] sm:$0xf] %v106_v63  ;;  %108 = vst [vmem:[#allocation2 + $0x10] sm:$0xf] %v88_v0  ;;  %v1521_v63 = vld [vmem:[%s1941_s1 + $0xa8] sm:$0xff]   ;;  %v1522_v0 = vld [vmem:[%s1941_s1 + $0xa0] sm:$0xff]  }
  0x14   :  { %1410 = vmatpush3.bf16.msra.mxu1 %v1510_v10  ;;  %1391 = vmatprep.subr.bf16.mxu0 %v1511_v11  ;;  %111 = vst [vmem:[#allocation2 + $0x14] sm:$0x1] %v110_v1  ;;  %v1523_v1 = vld [vmem:[%s1941_s1 + $0x98] sm:$0xff]  }
  0x15   :  { %1411 = vmatprep.subr.bf16.mxu1 %v1512_v12 }
  0x17   :  { %1392 = vmatpush3.bf16.msra.mxu0 %v1511_v11 }
  0x18   :  { %1412 = vmatpush3.bf16.msra.mxu1 %v1512_v12  ;;  %1393 = vmatprep.subr.bf16.mxu0 %v1513_v26  ;;  %v1739_v3 = vld [vmem:[#allocation2] sm:$0xf] }
  0x19   :  { %1413 = vmatprep.subr.bf16.mxu1 %v1514_v27  ;;  %v113_v4 = vld [vmem:[#allocation2 + $0x4] sm:$0xf]  ;;  %v132_v5 = vld [vmem:[#allocation2 + $0x8] sm:$0x1]  ;;  %v138_v6 = vshrl.u32 %v1739_v3, 16  ;;  %v141_v7 = vshll.u32 %v1739_v3, 16 }
  0x1a   :  { %v147_v8 = vshll.u32 %v113_v4, 16  ;;  %v151_v9 = vshrl.u32 %v113_v4, 16  ;;  %v157_v10 = vshll.u32 %v132_v5, 16  ;;  %v1197_v11 = vcombine.low %v1739_v3, %v113_v4  ;;  %v114_v12 = vld [vmem:[#allocation2 + $0xc] sm:$0xf] }
  0x1b   :  { %1394 = vmatpush3.bf16.msra.mxu0 %v1513_v26  ;;  %v140_v14 = vrot.slane %v138_v6, 4  ;;  %v143_v15 = vrot.slane %v141_v7, 5  ;;  %v1744_v16 = vld [vmem:[#allocation2 + $0x10] sm:$0xf]  ;;  %v1746_v17 = vld [vmem:[#allocation2 + $0x14] sm:$0x1] }
  0x1c   :  { %1414 = vmatpush3.bf16.msra.mxu1 %v1514_v27  ;;  %1395 = vmatprep.subr.bf16.mxu0 %v1515_v38  ;;  %v149_v18 = vrot.slane %v147_v8, 5  ;;  %v153_v19 = vrot.slane %v151_v9, 4  ;;  %v159_v21 = vrot.slane %v157_v10, 5  ;;  %v162_v22 = vshrl.u32 %v114_v12, 16  ;;  %v416_v29 = vld [vmem:[#allocation2] sm:$0xe] }
  0x1d   :  { %1415 = vmatprep.subr.bf16.mxu1 %v1516_v45  ;;  %1417 = vmatprep.mubr.bf16.mxu1 %v1197_v11  ;;  %v144_v25 = vor.u32 %v143_v15, %v140_v14  ;;  %v165_v26 = vshll.u32 %v114_v12, 16  ;;  %v171_v27 = vshll.u32 %v1744_v16, 16  ;;  %v175_v28 = vshrl.u32 %v1744_v16, 16  ;;  %v417_v6 = vld [vmem:[#allocation2 + $0xc] sm:$0xe]  ;;  %v1526_v10 = vld [vmem:[%s1941_s1 + $0x80] sm:$0xff]  }
  0x1e   :  { %v154_v32 = vor.u32 %v153_v19, %v149_v18  ;;  %v164_v33 = vrot.slane %v162_v22, 4  ;;  %v181_v34 = vshll.u32 %v1746_v17, 16  ;;  %v1198_v35 = vcombine.low %v114_v12, %v1744_v16  ;;  %v1527_v15 = vld [vmem:[%s1943_s2 + $0x38] sm:$0xff]   ;;  %v1531_v19 = vld [vmem:[%s1943_s2 + $0x70] sm:$0xff]   ;;  %v1533_v22 = vld [vmem:[%s1943_s2 + $0x68] sm:$0xff]  }
  0x1f   :  { %1396 = vmatpush3.bf16.msra.mxu0 %v1515_v38  ;;  %v145_v36 = vrot.slane %v144_v25, 4  ;;  %v167_v37 = vrot.slane %v165_v26, 5  ;;  %v173_v38 = vrot.slane %v171_v27, 5  ;;  %v177_v39 = vrot.slane %v175_v28, 4  ;;  %v1534_v25 = vld [vmem:[%s1943_s2 + $0x18] sm:$0xff]   ;;  %v1535_v26 = vld [vmem:[%s1943_s2 + $0x60] sm:$0xff]  }
  0x20   :  { %1416 = vmatpush3.bf16.msra.mxu1 %v1516_v45  ;;  %1421 = vmatprep.subr.bf16.mxu0 %v1736_v2  ;;  %v155_v41 = vrot.slane %v154_v32, 4  ;;  %v183_v42 = vrot.slane %v181_v34, 5  ;;  %v1207_v43 = vrot.slane %v416_v29, 9  ;;  %v427_v45 = vrot.slane %v113_v4, 5  ;;  %v1536_v27 = vld [vmem:[%s1943_s2 + $0x10] sm:$0xff]   ;;  %v1537_v28 = vld [vmem:[%s1943_s2 + $0x58] sm:$0xff]  }
  0x21   :  { %v150_v47 = vsel %vm1752_vm13, %v145_v36, %v149_v18  ;;  %v168_v48 = vor.u32 %v167_v37, %v164_v33  ;;  %v178_v49 = vor.u32 %v177_v39, %v173_v38  ;;  %v430_v50 = vrot.slane %v132_v5, 5  ;;  %v1525_v5 = vld [vmem:[%s1941_s1 + $0x88] sm:$0xff]   ;;  %v1539_v32 = vld [vmem:[%s1943_s2 + $0x50] sm:$0xff]   ;;  %v1540_v33 = vld [vmem:[%s1943_s2] sm:$0xff]  }
  0x22   :  { %v160_v51 = vsel %vm1752_vm13, %v155_v41, %v159_v21  ;;  %v428_v52 = vsel %vm1760_vm14, %v1207_v43, %v427_v45  ;;  %v429_v53 = vrot.slane %v427_v45, 4  ;;  %v434_v4 = vrot.slane %v1744_v16, 5  ;;  %v1528_v16 = vld [vmem:[%s1943_s2 + $0x30] sm:$0xff]   ;;  %v1530_v18 = vld [vmem:[%s1943_s2 + $0x28] sm:$0xff]   ;;  %v1532_v21 = vld [vmem:[%s1943_s2 + $0x20] sm:$0xff]  }
  0x23   :  { %1418 = vmatmul.mubr.bf16.vlgmr.msra.gmra.mxu1 %v1198_v35  ;;  %v1187_v54 = vcombine.low %v150_v47, %v160_v51  ;;  %v169_v55 = vrot.slane %v168_v48, 4  ;;  %v179_v56 = vrot.slane %v178_v49, 4  ;;  %v1208_v7 = vrot.slane %v417_v6, 9  ;;  %v1538_v29 = vld [vmem:[%s1943_s2 + $0x8] sm:$0xff]   ;;  %v1544_v35 = vld [vmem:[%s1943_s2 + $0x40] sm:$0xff]   ;;  %v1855_v36 = vld [vmem:[%s1943_s2 + $0xb8] sm:$0xff]  }
  0x24   :  { %v431_v57 = vsel %vm1760_vm14, %v429_v53, %v430_v50  ;;  %v436_v8 = vrot.slane %v434_v4, 4  ;;  %v437_v9 = vrot.slane %v1746_v17, 5  ;;  %v1529_v17 = vld [vmem:[%s1943_s2 + $0x78] sm:$0xff]   ;;  %v1542_v34 = vld [vmem:[%s1943_s2 + $0x48] sm:$0xff]   ;;  %v1235_v49 = vld [vmem:[%s1944_s3] ss:$0 sm:$0xff] }
  0x25   :  { %1397 = vmatprep.mubr.bf16.mxu0 %v1187_v54  ;;  %v174_v58 = vsel %vm1752_vm13, %v169_v55, %v173_v38  ;;  %v184_v59 = vsel %vm1752_vm13, %v179_v56, %v183_v42  ;;  %v1225_v60 = vcombine.low %v428_v52, %v431_v57  ;;  %v435_v11 = vsel %vm1760_vm14, %v1208_v7, %v434_v4 }
  0x26   :  { %v1188_v61 = vcombine.low %v174_v58, %v184_v59  ;;  %v438_v12 = vsel %vm1760_vm14, %v436_v8, %v437_v9  ;;  %1441 = vmatprep.subr.bf16.mxu1 %v1529_v17 }
  0x27   :  { %v1226_v14 = vcombine.low %v435_v11, %v438_v12  ;;  %1442 = vmatpush3.bf16.msra.mxu1 %v1529_v17 }
  0x28   :  { %1398 = vmatmul.mubr.bf16.vlgmr.msra.gmra.mxu0 %v1188_v61  ;;  %1443 = vmatprep.subr.bf16.mxu1 %v1531_v19 }
  0x29   :  { %1422 = vmatpush3.bf16.msra.mxu0 %v1736_v2  ;;  %1437 = vmatprep.mubr.bf16.mxu0 %v1225_v60  ;;  %v1524_v2 = vld [vmem:[%s1941_s1 + $0x90] sm:$0xff]  }
  0x2a   :  { %1423 = vmatprep.subr.bf16.mxu0 %v1520_v62 }
  0x2b   :  { %1444 = vmatpush3.bf16.msra.mxu1 %v1531_v19 }
  0x2c   :  { %1445 = vmatprep.subr.bf16.mxu1 %v1533_v22 }
  0x2d   :  { %1424 = vmatpush3.bf16.msra.mxu0 %v1520_v62 }
  0x2e   :  { %1425 = vmatprep.subr.bf16.mxu0 %v1521_v63 }
  0x2f   :  { %1446 = vmatpush3.bf16.msra.mxu1 %v1533_v22 }
  0x30   :  { %1447 = vmatprep.subr.bf16.mxu1 %v1535_v26 }
  0x31   :  { %1426 = vmatpush3.bf16.msra.mxu0 %v1521_v63 }
  0x32   :  { %1427 = vmatprep.subr.bf16.mxu0 %v1522_v0 }
  0x33   :  { %1448 = vmatpush3.bf16.msra.mxu1 %v1535_v26 }
  0x34   :  { %1449 = vmatprep.subr.bf16.mxu1 %v1537_v28 }
  0x35   :  { %1428 = vmatpush3.bf16.msra.mxu0 %v1522_v0 }
  0x36   :  { %1429 = vmatprep.subr.bf16.mxu0 %v1523_v1 }
  0x37   :  { %1450 = vmatpush3.bf16.msra.mxu1 %v1537_v28 }
  0x38   :  { %1451 = vmatprep.subr.bf16.mxu1 %v1539_v32 }
  0x39   :  { %1430 = vmatpush3.bf16.msra.mxu0 %v1523_v1 }
  0x3a   :  { %1431 = vmatprep.subr.bf16.mxu0 %v1524_v2 }
  0x3b   :  { %1452 = vmatpush3.bf16.msra.mxu1 %v1539_v32 }
  0x3c   :  { %1453 = vmatprep.subr.bf16.mxu1 %v1542_v34 }
  0x3d   :  { %1432 = vmatpush3.bf16.msra.mxu0 %v1524_v2 }
  0x3e   :  { %1433 = vmatprep.subr.bf16.mxu0 %v1525_v5 }
  0x3f   :  { %1454 = vmatpush3.bf16.msra.mxu1 %v1542_v34  ;;  %v662_v34 = vld [vmem:[#allocation2 + $0xc] sm:$0xf] }
  0x40   :  { %1455 = vmatprep.subr.bf16.mxu1 %v1544_v35 }
  0x41   :  { %1434 = vmatpush3.bf16.msra.mxu0 %v1525_v5 }
  0x42   :  { %1435 = vmatprep.subr.bf16.mxu0 %v1526_v10 }
  0x43   :  { %1456 = vmatpush3.bf16.msra.mxu1 %v1544_v35 }
  0x44   :  { %1481 = vmatprep.subr.bf16.mxu1 %v1855_v36 }
  0x45   :  { %1436 = vmatpush3.bf16.msra.mxu0 %v1526_v10 }
  0x46   :  { %1461 = vmatprep.subr.bf16.mxu0 %v1527_v15 }
  0x48   :  { %1438 = vmatmul.mubr.bf16.vlgmr.msra.gmra.mxu0 %v1226_v14 }
  0x49   :  { %1462 = vmatpush3.bf16.msra.mxu0 %v1527_v15 }
  0x4a   :  { %1463 = vmatprep.subr.bf16.mxu0 %v1528_v16 }
  0x4d   :  { %1464 = vmatpush3.bf16.msra.mxu0 %v1528_v16 }
  0x4e   :  { %1465 = vmatprep.subr.bf16.mxu0 %v1530_v18 }
  0x51   :  { %1466 = vmatpush3.bf16.msra.mxu0 %v1530_v18 }
  0x52   :  { %1467 = vmatprep.subr.bf16.mxu0 %v1532_v21 }
  0x55   :  { %1468 = vmatpush3.bf16.msra.mxu0 %v1532_v21 }
  0x56   :  { %1469 = vmatprep.subr.bf16.mxu0 %v1534_v25 }
  0x59   :  { %1470 = vmatpush3.bf16.msra.mxu0 %v1534_v25 }
  0x5a   :  { %1471 = vmatprep.subr.bf16.mxu0 %v1536_v27 }
  0x5d   :  { %1472 = vmatpush3.bf16.msra.mxu0 %v1536_v27 }
  0x5e   :  { %1473 = vmatprep.subr.bf16.mxu0 %v1538_v29 }
  0x61   :  { %1474 = vmatpush3.bf16.msra.mxu0 %v1538_v29 }
  0x62   :  { %1475 = vmatprep.subr.bf16.mxu0 %v1540_v33 }
  0x65   :  { %1476 = vmatpush3.bf16.msra.mxu0 %v1540_v33 }
  0xe3   :  { %v1419_v38 = vpop.f32.mrf.mxu1 }
  0xe5   :  { %v401_v41 = vpop.f32.mrf.mxu1 }
  0xe7   :  { %v1420_v43 = vpop.f32.mrf.mxu1 }
  0xe8   :  { %v1399_v37 = vpop.f32.mrf.mxu0 }
  0xe9   :  { %v410_v47 = vadd.f32 %v1419_v38, %v1399_v37  ;;  %v404_v52 = vpop.f32.mrf.mxu1 }
  0xea   :  { %v292_v39 = vpop.f32.mrf.mxu0 }
  0xeb   :  { %v402_v50 = vadd.f32 %v401_v41, %v292_v39 }
  0xec   :  { %v1400_v42 = vpop.f32.mrf.mxu0 }
  0xed   :  { %v413_v54 = vadd.f32 %v1420_v43, %v1400_v42 }
  0xee   :  { %v295_v45 = vpop.f32.mrf.mxu0 }
  0xef   :  { %v405_v58 = vadd.f32 %v404_v52, %v295_v45 }
 0x108   :  { %v1439_v48 = vpop.f32.mrf.mxu0 }
 0x109   :  { %v563_v51 = vadd.f32 %v1439_v48, %v410_v47 }
 0x10a   :  { %v546_v53 = vpop.f32.mrf.mxu0 }
 0x10b   :  { %v574_v55 = vadd.f32 %v1235_v49, %v563_v51  ;;  %v561_v56 = vadd.f32 %v546_v53, %v402_v50 }
 0x10c   :  { %v1440_v57 = vpop.f32.mrf.mxu0 }
 0x10d   :  { %v1238_v59 = vmul.f32 -1.442695, %v574_v55  ;;  %v572_v60 = vadd.f32 %v1235_v49, %v561_v56  ;;  %v564_v61 = vadd.f32 %v1440_v57, %v413_v54 }
 0x10e   :  { %v549_v62 = vpop.f32.mrf.mxu0 }
 0x10f   :  { %1553 = vpow2.f32 %v1238_v59  ;;  %v1236_v63 = vmul.f32 -1.442695, %v572_v60  ;;  %v575_v0 = vadd.f32 %v1235_v49, %v564_v61  ;;  %v562_v1 = vadd.f32 %v549_v62, %v405_v58  ;;  %v659_v59 = vld [vmem:[#allocation2 + $0x8] sm:$0x1] }
 0x111   :  { %1555 = vpow2.f32 %v1236_v63  ;;  %v1239_v2 = vmul.f32 -1.442695, %v575_v0  ;;  %v573_v4 = vadd.f32 %v1235_v49, %v562_v1  ;;  %v666_v49 = vld [vmem:[#allocation2 + $0x14] sm:$0x1] }
 0x113   :  { %1557 = vpow2.f32 %v1239_v2  ;;  %v1237_v5 = vmul.f32 -1.442695, %v573_v4 }
 0x115   :  { %1559 = vpow2.f32 %v1237_v5 }
 0x11c   :  { %v1554_v6 = vpop.eup %1553 }
 0x11d   :  { %v590_v7 = vadd.f32 1.0, %v1554_v6 }
 0x11e   :  { %v1556_v8 = vpop.eup %1555 }
 0x11f   :  { %1561 = vrcp.f32 %v590_v7  ;;  %v588_v9 = vadd.f32 1.0, %v1556_v8 }
 0x120   :  { %v1558_v10 = vpop.eup %1557 }
 0x121   :  { %1563 = vrcp.f32 %v588_v9  ;;  %v591_v11 = vadd.f32 1.0, %v1558_v10 }
 0x122   :  { %v1560_v12 = vpop.eup %1559 }
 0x123   :  { %1565 = vrcp.f32 %v591_v11  ;;  %v589_v14 = vadd.f32 1.0, %v1560_v12 }
 0x125   :  { %1567 = vrcp.f32 %v589_v14 }
 0x12c   :  { %v1562_v15 = vpop.eup %1561 }
 0x12d   :  { %v602_v16 = vmul.f32 %v1562_v15, %v574_v55 }
 0x12e   :  { %v1564_v17 = vpop.eup %1563 }
 0x12f   :  { %v1319_v18 = vpack.c.bf16 %v602_v16, %v602_v16  ;;  %v600_v19 = vmul.f32 %v1564_v17, %v572_v60 }
 0x130   :  { %v1566_v21 = vpop.eup %1565 }
 0x131   :  { %v634_v22 = vshrl.u32 %v1319_v18, 16  ;;  %v1317_v25 = vpack.c.bf16 %v600_v19, %v600_v19  ;;  %v603_v26 = vmul.f32 %v1566_v21, %v575_v0  ;;  %v637_v29 = vshll.u32 %v1319_v18, 16 }
 0x132   :  { %v1568_v27 = vpop.eup %1567 }
 0x133   :  { %v636_v28 = vrot.slane %v634_v22, 7  ;;  %v617_v32 = vshrl.u32 %v1317_v25, 16  ;;  %v1320_v33 = vpack.c.bf16 %v603_v26, %v603_v26  ;;  %v601_v35 = vmul.f32 %v1568_v27, %v573_v4 }
 0x134   :  { %v620_v39 = vshll.u32 %v1317_v25, 16 }
 0x135   :  { %v639_v37 = vor.u32 %v637_v29, %v636_v28  ;;  %v619_v38 = vrot.slane %v617_v32, 7  ;;  %v642_v41 = vshrl.u32 %v1320_v33, 16  ;;  %v1318_v42 = vpack.c.bf16 %v601_v35, %v601_v35 }
 0x136   :  { %v645_v48 = vshll.u32 %v1320_v33, 16  ;;  %v640_v51 = vrot.slane %v636_v28, 4 }
 0x137   :  { %v663_v43 = vsel %vm1708_vm7, %v639_v37, %v662_v34  ;;  %v622_v45 = vor.u32 %v620_v39, %v619_v38  ;;  %v644_v47 = vrot.slane %v642_v41, 7  ;;  %v625_v50 = vshrl.u32 %v1318_v42, 16 }
 0x138   :  { %664 = vst [vmem:[#allocation2 + $0xc] sm:$0xf] %v663_v43  ;;  %v628_v56 = vshll.u32 %v1318_v42, 16  ;;  %v623_v60 = vrot.slane %v619_v38, 4 }
 0x139   :  { %v656_v52 = vsel %vm1708_vm7, %v622_v45, %v1739_v3  ;;  %v647_v53 = vor.u32 %v645_v48, %v644_v47  ;;  %v649_v54 = vrot.slane %v644_v47, 4  ;;  %v627_v55 = vrot.slane %v625_v50, 7 }
 0x13a   :  { %657 = vst [vmem:[#allocation2] sm:$0xf] %v656_v52 }
 0x13b   :  { %v648_v57 = vsel %vm1717_vm8, %v640_v51, %v647_v53  ;;  %v667_v58 = vsel %vm1652_vm2, %v649_v54, %v666_v49  ;;  %v630_v61 = vor.u32 %v628_v56, %v627_v55  ;;  %v632_v62 = vrot.slane %v627_v55, 4 }
 0x13c   :  { %665 = vst [vmem:[#allocation2 + $0x10] sm:$0xf] %v648_v57  ;;  %668 = vst [vmem:[#allocation2 + $0x14] sm:$0x1] %v667_v58  ;;  %v1546_v57 = vld [vmem:[%s1943_s2 + $0xb0] sm:$0xff]  }
 0x13d   :  { %v631_v44 = vsel %vm1717_vm8, %v623_v60, %v630_v61  ;;  %v660_v3 = vsel %vm1652_vm2, %v632_v62, %v659_v59  ;;  %v1548_v59 = vld [vmem:[%s1943_s2 + $0xa0] sm:$0xff]   ;;  %v1549_v60 = vld [vmem:[%s1943_s2 + $0x98] sm:$0xff]   ;;  %v1551_v61 = vld [vmem:[%s1943_s2 + $0x88] sm:$0xff]  }
 0x13e   :  { %658 = vst [vmem:[#allocation2 + $0x4] sm:$0xf] %v631_v44  ;;  %661 = vst [vmem:[#allocation2 + $0x8] sm:$0x1] %v660_v3  ;;  %v1552_v44 = vld [vmem:[%s1943_s2 + $0x80] sm:$0xff]  }
 0x13f   :  { %v671_v63 = vld [vmem:[#allocation2 + $0xc] sm:$0xf] }
 0x140   :  { %v716_v0 = vshrl.u32 %v671_v63, 16  ;;  %v719_v1 = vshll.u32 %v671_v63, 16 }
 0x141   :  { %v669_v2 = vld [vmem:[#allocation2] sm:$0xf] }
 0x142   :  { %v692_v4 = vshrl.u32 %v669_v2, 16  ;;  %v695_v5 = vshll.u32 %v669_v2, 16  ;;  %v718_v7 = vrot.slane %v716_v0, 4  ;;  %v721_v10 = vrot.slane %v719_v1, 5  ;;  %v970_v42 = vld [vmem:[#allocation2] sm:$0xe] }
 0x143   :  { %v1874_v6 = vld [vmem:[#allocation2 + $0x10] sm:$0xf]  ;;  %v1877_v11 = vld [vmem:[#allocation2 + $0x14] sm:$0x1]  ;;  %v1280_v51 = vrot.slane %v970_v42, 9 }
 0x144   :  { %v694_v8 = vrot.slane %v692_v4, 4  ;;  %v697_v9 = vrot.slane %v695_v5, 5  ;;  %v729_v46 = vshrl.u32 %v1874_v6, 16  ;;  %v725_v13 = vshll.u32 %v1874_v6, 16 }
 0x145   :  { %v670_v12 = vld [vmem:[#allocation2 + $0x4] sm:$0xf]  ;;  %v689_v14 = vld [vmem:[#allocation2 + $0x8] sm:$0x1]  ;;  %v1271_v21 = vcombine.low %v671_v63, %v1874_v6  ;;  %v722_v22 = vor.u32 %v721_v10, %v718_v7  ;;  %v735_v26 = vshll.u32 %v1877_v11, 16  ;;  %v985_v62 = vrot.slane %v1874_v6, 5 }
 0x146   :  { %v731_v15 = vrot.slane %v729_v46, 4  ;;  %v705_v16 = vshrl.u32 %v670_v12, 16  ;;  %v1270_v17 = vcombine.low %v669_v2, %v670_v12  ;;  %v698_v18 = vor.u32 %v697_v9, %v694_v8  ;;  %v971_v63 = vld [vmem:[#allocation2 + $0xc] sm:$0xe] }
 0x147   :  { %v701_v19 = vshll.u32 %v670_v12, 16  ;;  %v727_v25 = vrot.slane %v725_v13, 5  ;;  %v711_v29 = vshll.u32 %v689_v14, 16  ;;  %v978_v32 = vrot.slane %v670_v12, 5 }
 0x148   :  { %1477 = vmatprep.mubr.bf16.mxu0 %v1270_v17  ;;  %v707_v28 = vrot.slane %v705_v16, 4  ;;  %v699_v34 = vrot.slane %v698_v18, 4  ;;  %v723_v38 = vrot.slane %v722_v22, 4  ;;  %v737_v41 = vrot.slane %v735_v26, 5 }
 0x149   :  { %v703_v27 = vrot.slane %v701_v19, 5  ;;  %1478 = vmatmul.mubr.bf16.vlgmr.msra.gmra.mxu0 %v1271_v21  ;;  %v732_v33 = vor.u32 %v731_v15, %v727_v25  ;;  %v980_v37 = vrot.slane %v978_v32, 4  ;;  %v713_v45 = vrot.slane %v711_v29, 5 }
 0x14a   :  { %v981_v47 = vrot.slane %v689_v14, 5  ;;  %v728_v54 = vsel %vm1752_vm13, %v723_v38, %v727_v25  ;;  %v979_v56 = vsel %vm1760_vm14, %v1280_v51, %v978_v32  ;;  %v987_v3 = vrot.slane %v985_v62, 4  ;;  %v1308_v14 = vld [vmem:[%s1945_s4] ss:$0 sm:$0xff] }
 0x14b   :  { %v708_v35 = vor.u32 %v707_v28, %v703_v27  ;;  %v733_v39 = vrot.slane %v732_v33, 4  ;;  %v704_v49 = vsel %vm1752_vm13, %v699_v34, %v703_v27  ;;  %v988_v0 = vrot.slane %v1877_v11, 5 }
 0x14c   :  { %v982_v52 = vsel %vm1760_vm14, %v980_v37, %v981_v47  ;;  %v1281_v1 = vrot.slane %v971_v63, 9 }
 0x14d   :  { %v709_v43 = vrot.slane %v708_v35, 4  ;;  %v738_v48 = vsel %vm1752_vm13, %v733_v39, %v737_v41  ;;  %v1298_v58 = vcombine.low %v979_v56, %v982_v52  ;;  %v989_v2 = vsel %vm1760_vm14, %v987_v3, %v988_v0 }
 0x14e   :  { %v1261_v55 = vcombine.low %v728_v54, %v738_v48  ;;  %v986_v4 = vsel %vm1760_vm14, %v1281_v1, %v985_v62 }
 0x14f   :  { %v714_v50 = vsel %vm1752_vm13, %v709_v43, %v713_v45  ;;  %v1299_v5 = vcombine.low %v986_v4, %v989_v2 }
 0x150   :  { %v1260_v53 = vcombine.low %v704_v49, %v714_v50 }
 0x152   :  { %1457 = vmatprep.mubr.bf16.mxu1 %v1260_v53 }
 0x153   :  { %1458 = vmatmul.mubr.bf16.vlgmr.msra.gmra.mxu1 %v1261_v55 }
 0x154   :  { %1482 = vmatpush3.bf16.msra.mxu1 %v1855_v36  ;;  %1497 = vmatprep.mubr.bf16.mxu1 %v1298_v58  ;;  %v1550_v36 = vld [vmem:[%s1943_s2 + $0x90] sm:$0xff]  }
 0x155   :  { %1483 = vmatprep.subr.bf16.mxu1 %v1546_v57 }
 0x158   :  { %1484 = vmatpush3.bf16.msra.mxu1 %v1546_v57 }
 0x159   :  { %1485 = vmatprep.subr.bf16.mxu1 %v1547_v31 }
 0x15c   :  { %1486 = vmatpush3.bf16.msra.mxu1 %v1547_v31 }
 0x15d   :  { %1487 = vmatprep.subr.bf16.mxu1 %v1548_v59 }
 0x160   :  { %1488 = vmatpush3.bf16.msra.mxu1 %v1548_v59 }
 0x161   :  { %1489 = vmatprep.subr.bf16.mxu1 %v1549_v60 }
 0x164   :  { %1490 = vmatpush3.bf16.msra.mxu1 %v1549_v60 }
 0x165   :  { %1491 = vmatprep.subr.bf16.mxu1 %v1550_v36 }
 0x168   :  { %1492 = vmatpush3.bf16.msra.mxu1 %v1550_v36 }
 0x169   :  { %1493 = vmatprep.subr.bf16.mxu1 %v1551_v61 }
 0x16c   :  { %1494 = vmatpush3.bf16.msra.mxu1 %v1551_v61 }
 0x16d   :  { %1495 = vmatprep.subr.bf16.mxu1 %v1552_v44 }
 0x170   :  { %1496 = vmatpush3.bf16.msra.mxu1 %v1552_v44 }
 0x173   :  { %1498 = vmatmul.mubr.bf16.vlgmr.msra.gmra.mxu1 %v1299_v5 }
 0x209   :  { %v1479_v8 = vpop.f32.mrf.mxu0 }
 0x20b   :  { %v955_v10 = vpop.f32.mrf.mxu0 }
 0x20d   :  { %v1480_v12 = vpop.f32.mrf.mxu0 }
 0x20f   :  { %v958_v21 = vpop.f32.mrf.mxu0 }
 0x213   :  { %v1459_v6 = vpop.f32.mrf.mxu1 }
 0x214   :  { %v964_v13 = vadd.f32 %v1479_v8, %v1459_v6 }
 0x215   :  { %v846_v7 = vpop.f32.mrf.mxu1 }
 0x216   :  { %v956_v15 = vadd.f32 %v955_v10, %v846_v7 }
 0x217   :  { %v1460_v9 = vpop.f32.mrf.mxu1 }
 0x218   :  { %v967_v40 = vadd.f32 %v1480_v12, %v1460_v9 }
 0x219   :  { %v849_v46 = vpop.f32.mrf.mxu1 }
 0x21a   :  { %v959_v25 = vadd.f32 %v958_v21, %v849_v46 }
 0x233   :  { %v1499_v11 = vpop.f32.mrf.mxu1 }
 0x234   :  { %v1114_v16 = vadd.f32 %v1499_v11, %v964_v13 }
 0x235   :  { %v1097_v17 = vpop.f32.mrf.mxu1 }
 0x236   :  { %v1125_v18 = vadd.f32 %v1308_v14, %v1114_v16  ;;  %v1112_v19 = vadd.f32 %v1097_v17, %v956_v15 }
 0x237   :  { %v1500_v22 = vpop.f32.mrf.mxu1 }
 0x238   :  { %v1129_v26 = vadd.f32 %v1125_v18, %v1682_v24  ;;  %v1123_v27 = vadd.f32 %v1308_v14, %v1112_v19  ;;  %v1115_v28 = vadd.f32 %v1500_v22, %v967_v40 }
 0x239   :  { %v1100_v29 = vpop.f32.mrf.mxu1 }
 0x23a   :  { %v1311_v32 = vmul.f32 -1.442695, %v1129_v26  ;;  %v1127_v33 = vadd.f32 %v1123_v27, %v1668_v20  ;;  %v1126_v34 = vadd.f32 %v1308_v14, %v1115_v28  ;;  %v1113_v35 = vadd.f32 %v1100_v29, %v959_v25 }
 0x23c   :  { %1569 = vpow2.f32 %v1311_v32  ;;  %v1309_v37 = vmul.f32 -1.442695, %v1127_v33  ;;  %v1130_v38 = vadd.f32 %v1126_v34, %v1699_v30  ;;  %v1124_v39 = vadd.f32 %v1308_v14, %v1113_v35 }
 0x23e   :  { %1571 = vpow2.f32 %v1309_v37  ;;  %v1312_v41 = vmul.f32 -1.442695, %v1130_v38  ;;  %v1128_v42 = vadd.f32 %v1124_v39, %v1677_v23 }
 0x240   :  { %1573 = vpow2.f32 %v1312_v41  ;;  %v1310_v43 = vmul.f32 -1.442695, %v1128_v42 }
 0x242   :  { %1575 = vpow2.f32 %v1310_v43 }
 0x249   :  { %v1570_v24 = vpop.eup %1569 }
 0x24a   :  { %v1145_v45 = vadd.f32 1.0, %v1570_v24 }
 0x24b   :  { %v1572_v47 = vpop.eup %1571 }
 0x24c   :  { %1577 = vrcp.f32 %v1145_v45  ;;  %v1143_v48 = vadd.f32 1.0, %v1572_v47 }
 0x24d   :  { %v1574_v20 = vpop.eup %1573 }
 0x24e   :  { %1579 = vrcp.f32 %v1143_v48  ;;  %v1146_v49 = vadd.f32 1.0, %v1574_v20 }
 0x24f   :  { %v1576_v50 = vpop.eup %1575 }
 0x250   :  { %1581 = vrcp.f32 %v1146_v49  ;;  %v1144_v51 = vadd.f32 1.0, %v1576_v50 }
 0x252   :  { %1583 = vrcp.f32 %v1144_v51 }
 0x259   :  { %v1578_v30 = vpop.eup %1577 }
 0x25a   :  { %v1157_v52 = vmul.f32 %v1578_v30, %v1129_v26 }
 0x25b   :  { %v1580_v53 = vpop.eup %1579 }
 0x25c   :  { %1161 = vst [vmem:[%s1946_s5 + $0x10] sm:$0xff] %v1157_v52  ;;  %v1155_v23 = vmul.f32 %v1580_v53, %v1127_v33 }
 0x25d   :  { %v1582_v54 = vpop.eup %1581 }
 0x25e   :  { %1159 = vst [vmem:[%s1946_s5] sm:$0xff] %v1155_v23  ;;  %v1158_v55 = vmul.f32 %v1582_v54, %v1130_v38 }
 0x25f   :  { %v1584_v56 = vpop.eup %1583 }
 0x260   :  { %1162 = vst [vmem:[%s1946_s5 + $0x18] sm:$0xff] %v1158_v55  ;;  %v1156_v57 = vmul.f32 %v1584_v56, %v1128_v42 }
 0x262   :  { %1160 = vst [vmem:[%s1946_s5 + $0x8] sm:$0xff] %v1156_v57 }

</bundles_post_ra>
